<compile_context>
chip_gen: v7x
topology: tpu7x:2x2x1
jax: 0.10.0
libtpu: 0.0.40
codegen_flags: <defaults>
</compile_context>

<pallas_src>
import functools

import jax
import jax.numpy as jnp
from jax import lax
from jax.experimental import pallas as pl
from jax.experimental.pallas import tpu as pltpu

EPS = 1e-12


# ---------------------------------------------------------------------------
# Tiny power iteration (Cout x K = 8 x 36): plain-JAX glue, all f32.
# Shared by the kernel wrapper and the reference so both use identical math.
# ---------------------------------------------------------------------------
def _power_iteration(w2d, u, v):
    wtu = w2d.T @ u
    v1 = wtu / (jnp.linalg.norm(wtu) + EPS)
    wv = w2d @ v1
    u1 = wv / (jnp.linalg.norm(wv) + EPS)
    sigma = jnp.dot(u1, wv)          # u . (W v) with the *updated* u, v
    return u1, v1, sigma


# ---------------------------------------------------------------------------
# Pallas kernel: fused (W @ patches) * (1/sigma) + bias, lane-dense output.
#   sig_ref : (1, 1)     f32  SMEM  -- 1/sigma
#   w_ref   : (Cout, K)  bf16 VMEM  -- unscaled W_bar.view(Cout, -1)
#   p_ref   : (K, tm)    bf16 VMEM  -- im2col patches block (K leading)
#   b_ref   : (Cout, 1)  f32  VMEM  -- conv bias
#   o_ref   : (Cout, tm) f32  VMEM
# ---------------------------------------------------------------------------
def _sn_conv_kernel(sig_ref, w_ref, p_ref, b_ref, o_ref):
    acc = jnp.dot(w_ref[...], p_ref[...], preferred_element_type=jnp.float32)
    o_ref[...] = (acc * sig_ref[0, 0] + b_ref[...]).astype(o_ref.dtype)


def _pick_tile_m(M):
    """Largest lane-aligned tile along M; keep >=2 grid steps when possible so
    dimension_semantics=("parallel",) can shard across v7x's two TensorCores."""
    if M % 128 != 0:
        return M                      # full-dim block (exempt from the 128 rule)
    tm = M
    if M >= 256 and (M // 2) % 128 == 0:
        tm = M // 2                   # at least 2 parallel grid steps
    tm = min(tm, 2048)                # tiny vs VMEM budget even double-buffered
    while M % tm != 0:
        tm -= 128
    return tm


# ---------------------------------------------------------------------------
# Wrapper: SpectralNorm(Conv2d).forward(x)
# ---------------------------------------------------------------------------
@functools.partial(jax.jit, static_argnames=("padding",))
def spectral_norm_conv2d(x, w_bar, bias, u, v, *, padding=1):
    N, Cin, H, W = x.shape
    Cout, _, kh, kw = w_bar.shape
    K = Cin * kh * kw

    # ---- spectral-norm statistics (tiny, plain-JAX, all f32) ----
    w2d = w_bar.reshape(Cout, K).astype(jnp.float32)
    u_new, v_new, sigma = _power_iteration(
        w2d, u.astype(jnp.float32), v.astype(jnp.float32))
    inv_sigma = (1.0 / sigma).reshape(1, 1).astype(jnp.float32)

    # ---- im2col with the contraction dim (K) leading: (K, M), M = N*Ho*Wo ----
    Ho, Wo = H, W                                     # stride 1, "same" padding
    xq = x.astype(jnp.bfloat16)                       # bf16 MXU inputs, f32 accum
    xp = jnp.pad(xq, ((0, 0), (0, 0), (padding, padding), (padding, padding)))
    cols = [xp[:, :, ki:ki + Ho, kj:kj + Wo]          # (N, Cin, Ho, Wo) each
            for ki in range(kh) for kj in range(kw)]
    patches = jnp.stack(cols, axis=2)                 # (N, Cin, kh*kw, Ho, Wo)
    patches = patches.transpose(1, 2, 0, 3, 4)        # leading-dim permute only
    patches = patches.reshape(K, N * Ho * Wo)         # K ordered (Cin, kh, kw)

    M = N * Ho * Wo
    tm = _pick_tile_m(M)
    grid_m = M // tm

    out2d = pl.pallas_call(
        _sn_conv_kernel,
        grid=(grid_m,),
        in_specs=[
            pl.BlockSpec(memory_space=pltpu.MemorySpace.SMEM),   # 1/sigma scalar
            pl.BlockSpec((Cout, K), lambda i: (0, 0)),           # weight (unscaled)
            pl.BlockSpec((K, tm), lambda i: (0, i)),             # patches block
            pl.BlockSpec((Cout, 1), lambda i: (0, 0)),           # bias
        ],
        out_specs=pl.BlockSpec((Cout, tm), lambda i: (0, i)),
        out_shape=jax.ShapeDtypeStruct((Cout, M), jnp.float32),
        compiler_params=pltpu.CompilerParams(
            dimension_semantics=("parallel",),
            vmem_limit_bytes=32 * 1024 * 1024,
        ),
    )(inv_sigma,
      w2d.astype(jnp.bfloat16),
      patches,
      bias.reshape(Cout, 1).astype(jnp.float32))

    # (Cout, M) -> (Cout, N, Ho, Wo) -> NCHW  (leading-dim permute, minor dims untouched)
    y = out2d.reshape(Cout, N, Ho, Wo).transpose(1, 0, 2, 3)
    return y, u_new, v_new


# ---------------------------------------------------------------------------
# References (mirror the PyTorch math) for sanity checks
# ---------------------------------------------------------------------------
def _reference(x, w_bar, bias, u, v):
    Cout = w_bar.shape[0]
    w2d = w_bar.reshape(Cout, -1).astype(jnp.float32)
    u1, v1, sigma = _power_iteration(w2d, u, v)
    w_sn = (w2d / sigma).reshape(w_bar.shape)
    y = lax.conv_general_dilated(
        x, w_sn, window_strides=(1, 1), padding=((1, 1), (1, 1)),
        dimension_numbers=("NCHW", "OIHW", "NCHW"),
        precision=lax.Precision.HIGHEST,
    ) + bias.reshape(1, Cout, 1, 1)
    return y, u1, v1


def _reference_quantized(x, w_bar, bias, u, v):
    """Same math, but with the kernel's bf16 input quantization (f32 accumulation,
    f32 sigma scaling and bias) -> allows a tight tolerance check."""
    Cout = w_bar.shape[0]
    w2d = w_bar.reshape(Cout, -1).astype(jnp.float32)
    _, _, sigma = _power_iteration(w2d, u, v)
    xq = x.astype(jnp.bfloat16).astype(jnp.float32)
    wq = w2d.astype(jnp.bfloat16).astype(jnp.float32).reshape(w_bar.shape)
    y = lax.conv_general_dilated(
        xq, wq, window_strides=(1, 1), padding=((1, 1), (1, 1)),
        dimension_numbers=("NCHW", "OIHW", "NCHW"),
        precision=lax.Precision.HIGHEST,
    ) * (1.0 / sigma) + bias.reshape(1, Cout, 1, 1)
    return y


if __name__ == "__main__":
    key = jax.random.PRNGKey(0)
    k_x, k_w, k_b, k_u, k_v = jax.random.split(key, 5)

    N, Cin, H, W = 2, 4, 16, 16
    Cout, kh, kw = 8, 3, 3

    x = jax.random.normal(k_x, (N, Cin, H, W), dtype=jnp.float32)
    # deterministic "parameters" of the wrapped Conv2d
    w_bar = jax.random.normal(k_w, (Cout, Cin, kh, kw), dtype=jnp.float32) * 0.1
    bias = jax.random.normal(k_b, (Cout,), dtype=jnp.float32) * 0.1
    # u, v buffers of SpectralNorm: N(0,1) then l2-normalized (as in _make_params)
    u0 = jax.random.normal(k_u, (Cout,), dtype=jnp.float32)
    v0 = jax.random.normal(k_v, (Cin * kh * kw,), dtype=jnp.float32)
    u0 = u0 / (jnp.linalg.norm(u0) + EPS)
    v0 = v0 / (jnp.linalg.norm(v0) + EPS)

    y, u_new, v_new = spectral_norm_conv2d(x, w_bar, bias, u0, v0, padding=1)
    jax.block_until_ready(y)

    y_ref, u_ref, v_ref = _reference(x, w_bar, bias, u0, v0)
    y_ref_q = _reference_quantized(x, w_bar, bias, u0, v0)

    assert y.shape == (N, Cout, H, W)
    # Tight check against a reference with identical bf16 input quantization.
    assert jnp.allclose(y, y_ref_q, atol=1e-4, rtol=1e-4)
    # Loose check against the full-f32 reference (bf16 MXU inputs, f32 accumulation).
    assert jnp.allclose(y, y_ref, atol=3e-2, rtol=3e-2)
    # Power-iteration / sigma path stays full f32.
    assert jnp.allclose(u_new, u_ref, atol=1e-5, rtol=1e-5)
    assert jnp.allclose(v_new, v_ref, atol=1e-5, rtol=1e-5)

    print("KERNEL_OK")
</pallas_src>

<mosaic_0001>
module attributes {stable_mosaic.version = 11 : i64} {
  func.func @_sn_conv_kernel(%arg0: i32, %arg1: memref<1x1xf32, #tpu.memory_space<smem>>, %arg2: memref<8x36xbf16, #tpu.memory_space<vmem>>, %arg3: memref<36x256xbf16, #tpu.memory_space<vmem>>, %arg4: memref<8x1xf32, #tpu.memory_space<vmem>>, %arg5: memref<8x256xf32, #tpu.memory_space<vmem>>) attributes {dimension_semantics = [#tpu.dimension_semantics<parallel>], iteration_bounds = array<i64: 2>, scalar_prefetch = 0 : i64, scratch_operands = 0 : i64, tpu.core_type = #tpu.core_type<tc>, window_params = [{transform_indices = @transform_0, window_bounds = array<i64: 1, 1>}, {pipeline_mode = #tpu.pipeline_mode<synchronous>, transform_indices = @transform_1, window_bounds = array<i64: 8, 36>}, {transform_indices = @transform_2, window_bounds = array<i64: 36, 256>}, {pipeline_mode = #tpu.pipeline_mode<synchronous>, transform_indices = @transform_3, window_bounds = array<i64: 8, 1>}, {transform_indices = @transform_4, window_bounds = array<i64: 8, 256>}]} {
    %c0 = arith.constant 0 : index
    %c0_0 = arith.constant 0 : index
    %0 = vector.load %arg2[%c0, %c0_0] : memref<8x36xbf16, #tpu.memory_space<vmem>>, vector<8x36xbf16>
    %c0_1 = arith.constant 0 : index
    %c0_2 = arith.constant 0 : index
    %1 = vector.load %arg3[%c0_1, %c0_2] : memref<36x256xbf16, #tpu.memory_space<vmem>>, vector<36x256xbf16>
    %cst = arith.constant dense<0.000000e+00> : vector<8x256xf32>
    %2 = tpu.matmul %0, %1, %cst {dimension_numbers = #tpu.dot_dimension_numbers<[1], [0], [0], [1], [0, 0, 1, 1], [], []>} : vector<8x36xbf16>, vector<36x256xbf16>, vector<8x256xf32> -> vector<8x256xf32>
    %c0_3 = arith.constant 0 : index
    %c0_4 = arith.constant 0 : index
    %3 = memref.load %arg1[%c0_3, %c0_4] : memref<1x1xf32, #tpu.memory_space<smem>>
    %4 = vector.broadcast %3 : f32 to vector<8x256xf32>
    %5 = arith.mulf %2, %4 : vector<8x256xf32>
    %c0_5 = arith.constant 0 : index
    %c0_6 = arith.constant 0 : index
    %6 = vector.load %arg4[%c0_5, %c0_6] : memref<8x1xf32, #tpu.memory_space<vmem>>, vector<8x1xf32>
    %7 = vector.broadcast %6 : vector<8x1xf32> to vector<8x256xf32>
    %8 = arith.addf %5, %7 : vector<8x256xf32>
    %c0_7 = arith.constant 0 : index
    %c0_8 = arith.constant 0 : index
    %9 = vector.load %arg5[%c0_7, %c0_8] : memref<8x256xf32, #tpu.memory_space<vmem>>, vector<8x256xf32>
    tpu.vector_store %arg5[%c0_7, %c0_8], %8 {strides = array<i32>} : memref<8x256xf32, #tpu.memory_space<vmem>>, vector<8x256xf32>,
    return
  }
  func.func @transform_0(%arg0: i32) -> (i32, i32) {
    %c0_i32 = arith.constant 0 : i32
    %c0_i32_0 = arith.constant 0 : i32
    %c0_i32_1 = arith.constant 0 : i32
    return %c0_i32, %c0_i32_0 : i32, i32
  }
  func.func @transform_1(%arg0: i32) -> (i32, i32) {
    %c0_i32 = arith.constant 0 : i32
    %c0_i32_0 = arith.constant 0 : i32
    %c0_i32_1 = arith.constant 0 : i32
    return %c0_i32, %c0_i32_0 : i32, i32
  }
  func.func @transform_2(%arg0: i32) -> (i32, i32) {
    %c0_i32 = arith.constant 0 : i32
    %c0_i32_0 = arith.constant 0 : i32
    return %c0_i32, %arg0 : i32, i32
  }
  func.func @transform_3(%arg0: i32) -> (i32, i32) {
    %c0_i32 = arith.constant 0 : i32
    %c0_i32_0 = arith.constant 0 : i32
    %c0_i32_1 = arith.constant 0 : i32
    return %c0_i32, %c0_i32_0 : i32, i32
  }
  func.func @transform_4(%arg0: i32) -> (i32, i32) {
    %c0_i32 = arith.constant 0 : i32
    %c0_i32_0 = arith.constant 0 : i32
    return %c0_i32, %arg0 : i32, i32
  }
}

</mosaic_0001>

<bundles_post_ra>
// kernel: spectral_norm_conv2d.1
= control target key start
LH: loop header
LB: loop body
LE: loop exit
PB: predicated region body
PF: predicated region fallthrough
CT: control target
= control target key end

     0   :  { %s579_s0 = inlined_call_operand.<no memory space> [shape: f32[1,1], index: 0, kind: input, shape index: {}]   ;;  %s580_s1 = inlined_call_operand.vmem [shape: bf16[8,36], index: 1, kind: input, shape index: {}]   ;;  %s581_s2 = inlined_call_operand.vmem [shape: bf16[36,512], index: 2, kind: input, shape index: {}]   ;;  %s582_s3 = inlined_call_operand.vmem [shape: f32[8,1], index: 3, kind: input, shape index: {}]   ;;  %s583_s4 = inlined_call_operand.vmem [shape: f32[8,512], index: 4, kind: output, shape index: {}]  }
   0x1   :  { %9 = sst [smem:[#allocation2]] %s579_s0 }
   0x2   :  { %s521_s17 = smov 0   ;;  %s523_s18 = smov 0  }
   0x3   :  { %s525_s19 = smov 0  }
   0x4 LB: > { %s412_s0 = sadd.s32 4294967295, %s490_s19   ;;  %s538_s20 = sadd.s32 1, %s490_s19   ;;  %s490_s19 = sphi %s525_s19, %s586_s19   ;;  %s486_s18 = sphi %s523_s18, %s585_s18   ;;  %s482_s17 = sphi %s521_s17, %s584_s17  }
   0x5   : > { %s61_s21 = ssub.s32 %s490_s19, %s538_s20  ;;  %s64_s22 = sadd.s32 1, %s486_s18 }
   0x6   : > { %p62_p0 = scmp.eq.s32.totalorder %s61_s21, 0  ;;  %p71_p1 = scmp.ne.s32.totalorder %s486_s18, %s482_s17 }
   0x7   : > { %p72_p2 = scmp.eq.s32.totalorder %s490_s19, 0  ;;  %p415_p4 = scmp.ge.s32.totalorder %s490_s19, 2 }
   0x8   : > { %s547_s23 = scalar_select %p62_p0, %s486_s18, %s64_s22  }
   0x9   : > { %p73_p3 = por %p72_p2, %p71_p1  ;;  %153 = sbr.rel (%p415_p4) target bundleno = 23 (0x17), region = 28 }
  0x10   : > { %156 = sbr.rel (!%p73_p3) target bundleno = 23 (0x17), region = 32  ;;  %s158_s24 = sand.u32 (%p73_p3), 1, %s486_s18  }
  0x11   : > { %s431_s25 = sshll.u32 (%p73_p3), %s490_s19, 3  ;;  %s432_s26 = smul.u32 (%p73_p3), 40, %s158_s24 }
  0x12   : > { %s163_s29 = scalar_lea.vmem (%p73_p3), %s581_s2, %s431_s25 }
  0x13   : > { %v199_v0 = vld [vmem:[%s163_s29] sm:$0xff] (%p73_p3)  ;;  %v201_v1 = vld [vmem:[%s163_s29 + $0x10] sm:$0xff] (%p73_p3)  ;;  %s160_s30 = scalar_lea.vmem (%p73_p3), [#allocation3], %s432_s26 }
  0x14   : > { %v203_v2 = vld [vmem:[%s163_s29 + $0x20] sm:$0xff] (%p73_p3)  ;;  %v205_v3 = vld [vmem:[%s163_s29 + $0x30] sm:$0xff] (%p73_p3)  ;;  %200 = vst [vmem:[%s160_s30] sm:$0xff] (%p73_p3), %v199_v0  ;;  %202 = vst [vmem:[%s160_s30 + $0x8] sm:$0xff] (%p73_p3), %v201_v1 }
  0x15   : > { %v207_v4 = vld [vmem:[%s163_s29 + $0x40] sm:$0xff] (%p73_p3)  ;;  %204 = vst [vmem:[%s160_s30 + $0x10] sm:$0xff] (%p73_p3), %v203_v2  ;;  %206 = vst [vmem:[%s160_s30 + $0x18] sm:$0xff] (%p73_p3), %v205_v3 }
  0x16   : > { %208 = vst [vmem:[%s160_s30 + $0x20] sm:$0xff] (%p73_p3), %v207_v4 }
  0x17 PF: > { %p418_p5 = scmp.ge.s32.totalorder %s490_s19, 1  ;;  %p213_p6 = scmp.lt.s32.totalorder %s490_s19, 3 }
  0x19   : > { %p214_p7 = pnand %p418_p5, %p213_p6 }
  0x1a   : > { %s220_s5 = sand.u32 (!%p214_p7), 1, %s482_s17   ;;  %v492_v5 = vmov (!%p214_p7), 0   ;;  %v340_v6 = vld [vmem:[%s582_s3] sm:$0xff] (!%p214_p7)  ;;  %vm288_vm0 = vcmask (!%p214_p7), 1041408   ;;  %vm284_vm1 = vcmask (!%p214_p7), 293888   ;;  %s419_s12 = sshll.u32 (!%p214_p7), %s412_s0, 1 }
  0x1b   : > { %217 = sbr.rel (%p214_p7) target bundleno = 262 (0x106), region = 70  ;;  %327 = vmatprep.mubr.bf16.mxu0 (!%p214_p7), %v492_v5  ;;  %459 = vset.pattern.permute.xlu0 (!%p214_p7), %v492_v5  ;;  %v253_v15 = vld [vmem:[%s580_s1] sm:$0xf] (!%p214_p7)  ;;  %s336_s13 = sld [smem:[#allocation2]] (!%p214_p7) }
  0x1c   : > { %s433_s6 = smul.u32 (!%p214_p7), 40, %s220_s5  ;;  %343 = vperm.xlu0 (!%p214_p7), %459, %v340_v6   ;;  %p247_p8 = scmp.lt.s32.totalorder (!%p214_p7), %s419_s12, 3 }
  0x1e   : > { %s222_s9 = scalar_lea.vmem (!%p214_p7), [#allocation3], %s433_s6 }
  0x1f   : > { %v460_v7 = vld [vmem:[%s222_s9 + $0x4] ss:$8 sps:$4 sm:$0xff] (!%p214_p7)   ;;  %v462_v8 = vld [vmem:[%s222_s9] ss:$8 sps:$4 sm:$0xff] (!%p214_p7)   ;;  %v463_v9 = vld [vmem:[%s222_s9 + $0x14] ss:$8 sps:$4 sm:$0xff] (!%p214_p7)  }
  0x20   : > { %295 = vmatprep.subr.bf16.mxu0 (!%p214_p7), %v460_v7  ;;  %v258_v10 = vld [vmem:[%s222_s9 + $0x20] sm:$0x33] (!%p214_p7)  ;;  %v465_v11 = vld [vmem:[%s222_s9 + $0x10] ss:$8 sps:$4 sm:$0xff] (!%p214_p7)  }
  0x21   : > { %296 = vmatpush1.bf16.msra.mxu0 (!%p214_p7), %v462_v8  ;;  %v426_v12 = vcombine.high (!%p214_p7), %v258_v10, %v258_v10  ;;  %v425_v13 = vcombine.low (!%p214_p7), %v258_v10, %v258_v10  ;;  %v337_v16 = vstv (!%p214_p7), %s336_s13 }
  0x22   : > { %297 = vmatprep.subr.bf16.mxu0 %v463_v9  ;;  %s588_s12 = smov (!%p247_p8, %s419_s12), 3 }
  0x23   : > { %v290_v14 = vsel %vm288_vm0, %v425_v13, 0  ;;  %s420_s14 = sshll.u32 %s588_s12, 3 }
  0x24   : > { %s250_s17 = scalar_lea.vmem %s583_s4, %s420_s14 }
  0x25   : > { %298 = vmatpush1.bf16.msra.mxu0 %v465_v11 }
  0x26   : > { %427 = vmatprep.subr.msk.bf16.mxu0 %vm288_vm0, %v426_v12 }
  0x29   : > { %300 = vmatpush1.bf16.msra.mxu0 %v290_v14 }
  0x2c   : > { %428 = vmatmul.mubr.msk.bf16.vlgmr.msra.gmra.mrb[0].mxu0 %vm284_vm1, %v253_v15 }
  0x9b   : > { %v344_v18 = vpop.permute.xlu0 %343 }
  0xff   : > { %v329_v17 = vpop.f32.mrb[0].mxu0 }
 0x100   : > { %v338_v19 = vmul.f32 %v337_v16, %v329_v17  ;;  %v331_v20 = vpop.f32.mrb[1].mxu0 }
 0x101   : > { %v339_v21 = vmul.f32 %v337_v16, %v331_v20  ;;  %v333_v22 = vpop.f32.mrb[2].mxu0 }
 0x102   : > { %v346_v23 = vadd.f32 %v344_v18, %v338_v19  ;;  %v334_v24 = vpop.f32.mrb[3].mxu0 }
 0x103   : > { %v347_v25 = vadd.f32 %v344_v18, %v339_v21 }
 0x104   : > { %348 = vst [vmem:[%s250_s17] sm:$0xff] %v346_v23 }
 0x105   : > { %349 = vst [vmem:[%s250_s17 + $0x8] sm:$0xff] %v347_v25 }
 0x106 PF: > { %p12_p9 = scmp.ge.s32.totalorder %s538_s20, 4   ;;  %s584_s17 = smov %s486_s18 }
 0x107   : > { %s585_s18 = smov %s547_s23  ;;  %s586_s19 = smov %s538_s20 }
 0x108   :  { %14 = sbr.rel (!%p12_p9) target bundleno = 4 (0x4), region = 109 }

</bundles_post_ra>
